<compile_context>
chip_gen: v6e
topology: v6e:2x2x1
jax: 0.10.0
libtpu: 0.0.40
codegen_flags: <defaults>
</compile_context>

<pallas_src>
import jax
import jax.numpy as jnp
from jax.experimental import pallas as pl
from jax.experimental.pallas import tpu as pltpu


def _scale_kernel(w_ref, x_ref, o_ref):
    # w_ref: (1, C, 1) resident per-channel scale; x_ref / o_ref: (bn, C, bl)
    # lane-dense blocks.  Broadcast multiply along batch (dim 0) and lanes
    # (dim 2); the scale cast is a scalar-cheap VPU op.
    scale = w_ref[...].astype(x_ref.dtype)
    o_ref[...] = (x_ref[...] * scale).astype(o_ref.dtype)


def scale_module_forward(weight, x, *, target_block_bytes=4 * 1024 * 1024):
    """out = weight * x with weight (1, C, 1, 1) and x (N, C, H, W)."""
    N, C, H, W = x.shape
    assert weight.shape == (1, C, 1, 1)

    L = H * W
    itemsize = jnp.dtype(x.dtype).itemsize
    w_itemsize = jnp.dtype(weight.dtype).itemsize

    x3 = x.reshape(N, C, L)          # metadata-only reshape of contiguous NCHW
    w3 = weight.reshape(1, C, 1)     # per-channel scale, fetched once

    def _round_up(v, m):
        return ((v + m - 1) // m) * m

    # Sublane packing granularity: 8 for 4-byte dtypes, 16 for bf16, 32 for i8.
    sub = 8 * max(1, 4 // itemsize)
    w_sub = 8 * max(1, 4 // w_itemsize)

    # Resident weight buffer: (1, C, 1) pads to (C_pad sublanes x 128 lanes).
    w_buf_bytes = _round_up(C, w_sub) * 128 * w_itemsize

    # Cap the x-block budget so 2 double-buffers x (x + out) + weight stays
    # under ~48 MiB -> safe on v7x's 64 MiB VMEM, trivially safe on v5e/v6e.
    budget_cap = (48 * 1024 * 1024 - 2 * w_buf_bytes - (4 << 20)) // 4
    block_bytes = max(128 * 128 * itemsize, min(target_block_bytes, budget_cap))
    budget_elems = max(1, block_bytes // itemsize)

    # --- choose (bn, bl): block over batch when a (C, L) slab is small, over
    # lane chunks (multiples of 128) when a single slab exceeds the budget. ---
    slab_elems = C * L
    if slab_elems <= budget_elems:
        bl = L
        bn = min(N, max(1, budget_elems // slab_elems))
    else:
        bn = 1
        if L <= 128:
            bl = L
        else:
            bl = max(128, min(L, (budget_elems // C // 128) * 128))
            if bl >= L:
                bl = L  # full extent: no 128-divisibility requirement

    # --- guarantee >= 2 grid steps on non-trivial tensors so v7x's second
    # TensorCore (parallel grid axes) is not left idle. ----------------------
    total_bytes = N * C * L * itemsize
    if pl.cdiv(N, bn) * pl.cdiv(L, bl) == 1 and total_bytes >= (1 << 20):
        if bn > 1:
            bn = pl.cdiv(bn, 2)
        elif bl > 128:
            bl = max(128, ((bl // 2) // 128) * 128)  # bl < L => multiple of 128

    gn = pl.cdiv(N, bn)
    gl = pl.cdiv(L, bl)

    # Explicit scoped-VMEM limit: double-buffered x + out blocks, resident
    # weight (counted twice to be safe) and headroom; never below the default.
    x_blk_bytes = bn * _round_up(C, sub) * _round_up(bl, 128) * itemsize
    resident = 4 * x_blk_bytes + 2 * w_buf_bytes
    vmem_limit = int(max(resident + (4 << 20), 32 * 1024 * 1024))

    out3 = pl.pallas_call(
        _scale_kernel,
        out_shape=jax.ShapeDtypeStruct((N, C, L), x.dtype),
        grid_spec=pltpu.PrefetchScalarGridSpec(
            num_scalar_prefetch=0,
            grid=(gn, gl),
            in_specs=[
                # Whole per-channel weight; constant block index => fetched
                # once and kept resident (no per-step weight DMA / padding).
                pl.BlockSpec((1, C, 1), lambda n, l: (0, 0, 0)),
                # Lane-dense x block: bn batch slabs x all C channels x a
                # 128-multiple chunk of H*W.
                pl.BlockSpec((bn, C, bl), lambda n, l: (n, 0, l)),
            ],
            out_specs=pl.BlockSpec((bn, C, bl), lambda n, l: (n, 0, l)),
        ),
        compiler_params=pltpu.CompilerParams(
            # Both axes independent: lets v7x shard steps across its 2 TCs;
            # neutral on single-TC v5e/v6e.
            dimension_semantics=("parallel", "parallel"),
            vmem_limit_bytes=vmem_limit,
        ),
        cost_estimate=pl.CostEstimate(
            flops=N * C * L,
            transcendentals=0,
            bytes_accessed=2 * N * C * L * itemsize + C * w_itemsize,
        ),
    )(w3, x3)

    return out3.reshape(N, C, H, W)


if __name__ == "__main__":
    key = jax.random.PRNGKey(0)
    k_x, k_w, k_x2 = jax.random.split(key, 3)

    # Shape implied by the module: NCHW input, (1, C, 1, 1) weight.
    N, C, H, W = 2, 4, 16, 16
    weight = jax.random.normal(k_w, (1, C, 1, 1), dtype=jnp.float32)
    x = jax.random.normal(k_x, (N, C, H, W), dtype=jnp.float32)

    out = jax.block_until_ready(scale_module_forward(weight, x))
    ref = weight * x
    assert out.shape == x.shape
    assert jnp.allclose(out, ref, atol=1e-6), "mismatch vs reference"

    # Default-init path of the module (ones * init_scale).
    init_scale = 0.5
    w_init = jnp.ones((1, C, 1, 1), dtype=jnp.float32) * init_scale
    out2 = jax.block_until_ready(scale_module_forward(w_init, x))
    assert jnp.allclose(out2, w_init * x, atol=1e-6), "mismatch vs reference (init)"

    # Odd spatial size (H*W not a multiple of 128) exercises the masked-lane
    # tail path.
    N2, C2, H2, W2 = 4, 8, 7, 7
    w_b = jax.random.normal(k_w, (1, C2, 1, 1), dtype=jnp.float32)
    x_b = jax.random.normal(k_x2, (N2, C2, H2, W2), dtype=jnp.float32)
    out3 = jax.block_until_ready(scale_module_forward(w_b, x_b))
    assert jnp.allclose(out3, w_b * x_b, atol=1e-6), "mismatch vs reference (7x7)"

    print("KERNEL_OK")
</pallas_src>

<mosaic_0001>
module attributes {stable_mosaic.version = 11 : i64} {
  func.func @_scale_kernel(%arg0: i32, %arg1: i32, %arg2: memref<1x4x1xf32, #tpu.memory_space<vmem>>, %arg3: memref<2x4x256xf32, #tpu.memory_space<vmem>>, %arg4: memref<2x4x256xf32, #tpu.memory_space<vmem>>) attributes {dimension_semantics = [#tpu.dimension_semantics<parallel>, #tpu.dimension_semantics<parallel>], iteration_bounds = array<i64: 1, 1>, scalar_prefetch = 0 : i64, scratch_operands = 0 : i64, tpu.core_type = #tpu.core_type<tc>, window_params = [{pipeline_mode = #tpu.pipeline_mode<synchronous>, transform_indices = @transform_0, window_bounds = array<i64: 1, 4, 1>}, {transform_indices = @transform_1, window_bounds = array<i64: 2, 4, 256>}, {transform_indices = @transform_2, window_bounds = array<i64: 2, 4, 256>}]} {
    %c0 = arith.constant 0 : index
    %c0_0 = arith.constant 0 : index
    %c0_1 = arith.constant 0 : index
    %0 = vector.load %arg2[%c0, %c0_0, %c0_1] : memref<1x4x1xf32, #tpu.memory_space<vmem>>, vector<1x4x1xf32>
    %c0_2 = arith.constant 0 : index
    %c0_3 = arith.constant 0 : index
    %c0_4 = arith.constant 0 : index
    %1 = vector.load %arg3[%c0_2, %c0_3, %c0_4] : memref<2x4x256xf32, #tpu.memory_space<vmem>>, vector<2x4x256xf32>
    %2 = vector.broadcast %0 : vector<1x4x1xf32> to vector<2x4x256xf32>
    %3 = arith.mulf %1, %2 : vector<2x4x256xf32>
    %c0_5 = arith.constant 0 : index
    %c0_6 = arith.constant 0 : index
    %c0_7 = arith.constant 0 : index
    %4 = vector.load %arg4[%c0_5, %c0_6, %c0_7] : memref<2x4x256xf32, #tpu.memory_space<vmem>>, vector<2x4x256xf32>
    tpu.vector_store %arg4[%c0_5, %c0_6, %c0_7], %3 {strides = array<i32>} : memref<2x4x256xf32, #tpu.memory_space<vmem>>, vector<2x4x256xf32>,
    return
  }
  func.func @transform_0(%arg0: i32, %arg1: i32) -> (i32, i32, i32) {
    %c0_i32 = arith.constant 0 : i32
    %c0_i32_0 = arith.constant 0 : i32
    %c0_i32_1 = arith.constant 0 : i32
    %c0_i32_2 = arith.constant 0 : i32
    return %c0_i32, %c0_i32_0, %c0_i32_1 : i32, i32, i32
  }
  func.func @transform_1(%arg0: i32, %arg1: i32) -> (i32, i32, i32) {
    %c0_i32 = arith.constant 0 : i32
    %c0_i32_0 = arith.constant 0 : i32
    return %arg0, %c0_i32, %arg1 : i32, i32, i32
  }
  func.func @transform_2(%arg0: i32, %arg1: i32) -> (i32, i32, i32) {
    %c0_i32 = arith.constant 0 : i32
    %c0_i32_0 = arith.constant 0 : i32
    return %arg0, %c0_i32, %arg1 : i32, i32, i32
  }
}

</mosaic_0001>

<bundles_post_ra>
// kernel: tpu_custom_call.1
= control target key start
LH: loop header
LB: loop body
LE: loop exit
PB: predicated region body
PF: predicated region fallthrough
CT: control target
= control target key end

     0   :  { %7 = vsyncpa [#allocation3], 0  ;;  %s149_s0 = inlined_call_operand.vmem [shape: f32[1,4,1], index: 0, kind: input, shape index: {}]   ;;  %s150_s1 = inlined_call_operand.hbm [shape: f32[2,4,256], index: 1, kind: input, shape index: {}]   ;;  %s151_s2 = inlined_call_operand.hbm [shape: f32[2,4,256], index: 2, kind: output, shape index: {}]  }
   0x1   :  { %8 = vsyncpa [#allocation4], 0  ;;  %s113_s9 = smov [#allocation2]  }
   0x2   :  { %s16_s10 = sshll.u32 %s113_s9, 4  ;;  %s17_s10 = int_to_ptr.vmem [resolvable:$true] %s16_s10 }
   0x3   :  { %s77_s11 = scalar_lea.vmem %s17_s10, 256  ;;  %p82_p1 = scmp.lt.s32.totalorder %s17_s10, %s17_s10 }
   0x4   :  { %p78_p0 = scmp.ne.s32.totalorder %s17_s10, %s77_s11  ;;  %p83_p2 = scmp.lt.s32.totalorder %s77_s11, %s77_s11 }
   0x6   :  { %p84_p3 = por %p83_p2, %p82_p1 }
   0x8   :  { %p85_p4 = pnand %p84_p3, %p78_p0 }
   0xa   :  { %88 = shalt.err (!%p85_p4)
}
   0xb   :  { %s114_s12 = smov 128   ;;  %s115_s13 = smov 8  }
   0xc   :  { %22 = dma.hbm_to_vmem [thread:$0]  %s150_s1, 256, %s17_s10, [#allocation3], %s114_s12, %s114_s12, %s115_s13  }
   0xd   :  { %109 = dma.done.wait [#allocation3], 256  }
   0xe   :  { %110 = vsyncadd [#allocation3], 4294967040  ;;  %v116_v0 = vmov 0   ;;  %v26_v1 = vld [vmem:[%s149_s0] sm:$0xf]  ;;  %v36_v4 = vlaneseq  ;;  %v28_v9 = vld [vmem:[#allocation2 + $0x8] sm:$0xff] }
   0xf   :  { %68 = vset.pattern.permute.xlu0 %v116_v0  ;;  %v117_v2 = vmov 839922192   ;;  %v27_v8 = vld [vmem:[#allocation2] sm:$0xff]  ;;  %s118_s18 = smov [#allocation5]  }
  0x10   :  { %31 = vperm.xlu0 %68, %v26_v1   ;;  %v34_v3 = vunpack.c.l.s4 %v117_v2  ;;  %v37_v6 = vshrl.u32 %v36_v4, 7  ;;  %s50_s1 = sshll.u32 %s118_s18, 4  ;;  %s51_s1 = int_to_ptr.vmem [resolvable:$true] %s50_s1 }
  0x11   :  { %s89_s19 = scalar_lea.vmem %s51_s1, 256  ;;  %p94_p6 = scmp.lt.s32.totalorder %s51_s1, %s51_s1 }
  0x12   :  { %v35_v5 = vunpack.c.0.s8 %v34_v3  ;;  %p90_p5 = scmp.ne.s32.totalorder %s51_s1, %s89_s19  ;;  %p95_p7 = scmp.lt.s32.totalorder %s89_s19, %s89_s19 }
  0x14   :  { %v38_v7 = vsub.s32 %v35_v5, %v37_v6  ;;  %p96_p8 = por %p95_p7, %p94_p6 }
  0x16   :  { %p97_p9 = pnand %p96_p8, %p90_p5 }
  0x8b   :  { %v32_v10 = vpop.permute.xlu0 %31 }
  0x8c   :  { %v39_v11 = vrot.slane %v32_v10, %v38_v7 }
  0x8e   :  { %v41_v12 = vmul.f32 %v39_v11, %v27_v8  ;;  %v42_v13 = vmul.f32 %v39_v11, %v28_v9 }
  0x90   :  { %43 = vst [vmem:[#allocation5] sm:$0xff] %v41_v12  ;;  %44 = vst [vmem:[#allocation5 + $0x8] sm:$0xff] %v42_v13 }
  0x91   :  { %100 = shalt.err (!%p97_p9)
}
  0x92   :  { %56 = dma.vmem_to_hbm [thread:$0]  %s51_s1, 256, %s151_s2, [#allocation4], %s114_s12, %s114_s12, %s115_s13  }
  0x93   :  { %111 = dma.done.wait [#allocation4], 256  }
  0x94   :  { %112 = vsyncadd [#allocation4], 4294967040 }
  0x95   :  { %60 = vsyncpa [#allocation3], 1 }
  0x96   :  { %61 = vsyncpa [#allocation4], 1 }

</bundles_post_ra>
